<compile_context>
chip_gen: v5e
topology: v5e:2x2
jax: 0.10.0
libtpu: 0.0.40
codegen_flags: <defaults>
</compile_context>

<pallas_src>
import functools

import jax
import jax.numpy as jnp
from jax.experimental import pallas as pl
from jax.experimental.pallas import tpu as pltpu

_OUT_PAD = 128  # lane-dense padded output width (true output dim is 2)


def _mlp_kernel(x_ref, w1_ref, b1_ref, w2_ref, b2_ref, w34_ref, b34_ref,
                o_ref):
    x = x_ref[...]                                     # [bt, 2]
    # Layer 1 (K=2) on the VPU: two broadcast FMAs, no MXU push/pop.
    h = (x[:, 0:1] * w1_ref[0:1, :]
         + x[:, 1:2] * w1_ref[1:2, :]
         + b1_ref[...])                                # [bt, nf*16]
    h = jnp.maximum(h, 0.0)
    # Layer 2 (K = nf*16) on the MXU.
    h = jnp.dot(h, w2_ref[...],
                preferred_element_type=jnp.float32) + b2_ref[...]
    h = jnp.maximum(h, 0.0)
    # Fused layers 3+4 (K = nf*8), lane-dense (128-wide, zero-padded) output.
    out = jnp.dot(h, w34_ref[...],
                  preferred_element_type=jnp.float32) + b34_ref[...]
    o_ref[...] = out.astype(o_ref.dtype)


def _round_up(n, m):
    return ((n + m - 1) // m) * m


@functools.partial(jax.jit, static_argnames=("batch_tile",))
def simple_score_fn_forward(x, params, *, batch_tile=256):
    """x: [B, ...] flattened to [B, 2].  Returns [B, 2]."""
    x = x.reshape(x.shape[0], -1)            # nn.Flatten
    B, Fin = x.shape
    assert Fin == 2, "simple_score_fn expects 2 flattened input features"

    w1, b1, w2, b2, w3, b3, w4, b4 = params
    d1, d2, d4 = w1.shape[1], w2.shape[1], w4.shape[1]

    # Fuse the two back-to-back linear layers (no nonlinearity between them)
    # and zero-pad the fused map so the kernel's output is lane-dense.
    w34 = jnp.dot(w3, w4, preferred_element_type=jnp.float32)        # [nf*8, 2]
    b34 = jnp.dot(b3, w4, preferred_element_type=jnp.float32) + b4   # [1, 2]
    w34 = jnp.pad(w34, ((0, 0), (0, _OUT_PAD - d4))).astype(x.dtype)
    b34 = jnp.pad(b34, ((0, 0), (0, _OUT_PAD - d4))).astype(x.dtype)

    # Batch tiling: large tiles for MXU occupancy; tiny B -> single grid step.
    bt = min(batch_tile, _round_up(B, 8))
    B_pad = _round_up(B, bt)
    if B_pad != B:
        x = jnp.pad(x, ((0, B_pad - B), (0, 0)))

    grid = (B_pad // bt,)

    def x_map(i):
        return (i, 0)

    def const_map(i):
        return (0, 0)

    out = pl.pallas_call(
        _mlp_kernel,
        out_shape=jax.ShapeDtypeStruct((B_pad, _OUT_PAD), x.dtype),
        grid_spec=pltpu.PrefetchScalarGridSpec(
            num_scalar_prefetch=0,
            grid=grid,
            in_specs=[
                pl.BlockSpec((bt, Fin), x_map),
                pl.BlockSpec((Fin, d1), const_map),
                pl.BlockSpec((1, d1), const_map),
                pl.BlockSpec((d1, d2), const_map),
                pl.BlockSpec((1, d2), const_map),
                pl.BlockSpec((d2, _OUT_PAD), const_map),
                pl.BlockSpec((1, _OUT_PAD), const_map),
            ],
            out_specs=pl.BlockSpec((bt, _OUT_PAD), x_map),
        ),
        compiler_params=pltpu.CompilerParams(
            dimension_semantics=("parallel",)),
    )(x, w1, b1, w2, b2, w34, b34)

    # Slice off padded batch rows and padded output lanes.
    return out[:B, :d4]


def init_params(key, nf, dtype=jnp.float32):
    """Deterministic init.  Weights stored transposed: [in, out]."""
    dims = [2, nf * 16, nf * 8, nf * 4, 2]
    params = []
    for i in range(4):
        key, kw, kb = jax.random.split(key, 3)
        fan_in = dims[i]
        bound = 1.0 / jnp.sqrt(fan_in)
        w = jax.random.uniform(kw, (dims[i], dims[i + 1]), dtype,
                               minval=-bound, maxval=bound)
        b = jax.random.uniform(kb, (1, dims[i + 1]), dtype,
                               minval=-bound, maxval=bound)
        params.extend([w, b])
    return tuple(params)


def reference_forward(x, params):
    x = x.reshape(x.shape[0], -1)
    w1, b1, w2, b2, w3, b3, w4, b4 = params
    h = jnp.maximum(x @ w1 + b1, 0.0)
    h = jnp.maximum(h @ w2 + b2, 0.0)
    h = h @ w3 + b3
    return h @ w4 + b4


if __name__ == "__main__":
    nf = 8          # config.model.nf
    key = jax.random.PRNGKey(0)
    kx, kp, kx2 = jax.random.split(key, 3)

    params = init_params(kp, nf)

    # Small batch: collapses to a single grid step with a whole-array block.
    x = jax.random.normal(kx, (16, 2), dtype=jnp.float32)
    out = jax.block_until_ready(simple_score_fn_forward(x, params))
    ref = reference_forward(x, params)
    assert out.shape == (16, 2)
    assert jnp.allclose(out, ref, atol=1e-4, rtol=1e-4), "mismatch (small B)"

    # Larger, non-tile-multiple batch: exercises padding + multi-step grid.
    x2 = jax.random.normal(kx2, (272, 2), dtype=jnp.float32)
    out2 = jax.block_until_ready(simple_score_fn_forward(x2, params))
    ref2 = reference_forward(x2, params)
    assert out2.shape == (272, 2)
    assert jnp.allclose(out2, ref2, atol=1e-4, rtol=1e-4), "mismatch (large B)"

    print("KERNEL_OK")
</pallas_src>

<mosaic_0001>
module attributes {stable_mosaic.version = 11 : i64} {
  func.func @_mlp_kernel(%arg0: i32, %arg1: memref<16x2xf32, #tpu.memory_space<vmem>>, %arg2: memref<2x128xf32, #tpu.memory_space<vmem>>, %arg3: memref<1x128xf32, #tpu.memory_space<vmem>>, %arg4: memref<128x64xf32, #tpu.memory_space<vmem>>, %arg5: memref<1x64xf32, #tpu.memory_space<vmem>>, %arg6: memref<64x128xf32, #tpu.memory_space<vmem>>, %arg7: memref<1x128xf32, #tpu.memory_space<vmem>>, %arg8: memref<16x128xf32, #tpu.memory_space<vmem>>) attributes {dimension_semantics = [#tpu.dimension_semantics<parallel>], iteration_bounds = array<i64: 1>, scalar_prefetch = 0 : i64, scratch_operands = 0 : i64, tpu.core_type = #tpu.core_type<tc>, window_params = [{transform_indices = @transform_0, window_bounds = array<i64: 16, 2>}, {pipeline_mode = #tpu.pipeline_mode<synchronous>, transform_indices = @transform_1, window_bounds = array<i64: 2, 128>}, {pipeline_mode = #tpu.pipeline_mode<synchronous>, transform_indices = @transform_2, window_bounds = array<i64: 1, 128>}, {pipeline_mode = #tpu.pipeline_mode<synchronous>, transform_indices = @transform_3, window_bounds = array<i64: 128, 64>}, {pipeline_mode = #tpu.pipeline_mode<synchronous>, transform_indices = @transform_4, window_bounds = array<i64: 1, 64>}, {pipeline_mode = #tpu.pipeline_mode<synchronous>, transform_indices = @transform_5, window_bounds = array<i64: 64, 128>}, {pipeline_mode = #tpu.pipeline_mode<synchronous>, transform_indices = @transform_6, window_bounds = array<i64: 1, 128>}, {transform_indices = @transform_7, window_bounds = array<i64: 16, 128>}]} {
    %c0 = arith.constant 0 : index
    %c0_0 = arith.constant 0 : index
    %0 = vector.load %arg1[%c0, %c0_0] : memref<16x2xf32, #tpu.memory_space<vmem>>, vector<16x2xf32>
    %1 = vector.extract_strided_slice %0 {offsets = [0, 0], sizes = [16, 1], strides = [1, 1]} : vector<16x2xf32> to vector<16x1xf32>
    %c0_1 = arith.constant 0 : index
    %c0_2 = arith.constant 0 : index
    %2 = vector.load %arg2[%c0_1, %c0_2] : memref<2x128xf32, #tpu.memory_space<vmem>>, vector<1x128xf32>
    %3 = vector.broadcast %1 : vector<16x1xf32> to vector<16x128xf32>
    %4 = vector.broadcast %2 : vector<1x128xf32> to vector<16x128xf32>
    %5 = arith.mulf %3, %4 : vector<16x128xf32>
    %6 = vector.extract_strided_slice %0 {offsets = [0, 1], sizes = [16, 1], strides = [1, 1]} : vector<16x2xf32> to vector<16x1xf32>
    %c1 = arith.constant 1 : index
    %c0_3 = arith.constant 0 : index
    %7 = vector.load %arg2[%c1, %c0_3] : memref<2x128xf32, #tpu.memory_space<vmem>>, vector<1x128xf32>
    %8 = vector.broadcast %6 : vector<16x1xf32> to vector<16x128xf32>
    %9 = vector.broadcast %7 : vector<1x128xf32> to vector<16x128xf32>
    %10 = arith.mulf %8, %9 : vector<16x128xf32>
    %11 = arith.addf %5, %10 : vector<16x128xf32>
    %c0_4 = arith.constant 0 : index
    %c0_5 = arith.constant 0 : index
    %12 = vector.load %arg3[%c0_4, %c0_5] : memref<1x128xf32, #tpu.memory_space<vmem>>, vector<1x128xf32>
    %13 = vector.broadcast %12 : vector<1x128xf32> to vector<16x128xf32>
    %14 = arith.addf %11, %13 : vector<16x128xf32>
    %cst = arith.constant 0.000000e+00 : f32
    %15 = vector.broadcast %cst : f32 to vector<16x128xf32>
    %16 = arith.maximumf %14, %15 : vector<16x128xf32>
    %c0_6 = arith.constant 0 : index
    %c0_7 = arith.constant 0 : index
    %17 = vector.load %arg4[%c0_6, %c0_7] : memref<128x64xf32, #tpu.memory_space<vmem>>, vector<128x64xf32>
    %cst_8 = arith.constant dense<0.000000e+00> : vector<16x64xf32>
    %18 = tpu.matmul %16, %17, %cst_8 {dimension_numbers = #tpu.dot_dimension_numbers<[1], [0], [0], [1], [0, 0, 1, 1], [], []>} : vector<16x128xf32>, vector<128x64xf32>, vector<16x64xf32> -> vector<16x64xf32>
    %c0_9 = arith.constant 0 : index
    %c0_10 = arith.constant 0 : index
    %19 = vector.load %arg5[%c0_9, %c0_10] : memref<1x64xf32, #tpu.memory_space<vmem>>, vector<1x64xf32>
    %20 = vector.broadcast %19 : vector<1x64xf32> to vector<16x64xf32>
    %21 = arith.addf %18, %20 : vector<16x64xf32>
    %cst_11 = arith.constant 0.000000e+00 : f32
    %22 = vector.broadcast %cst_11 : f32 to vector<16x64xf32>
    %23 = arith.maximumf %21, %22 : vector<16x64xf32>
    %c0_12 = arith.constant 0 : index
    %c0_13 = arith.constant 0 : index
    %24 = vector.load %arg6[%c0_12, %c0_13] : memref<64x128xf32, #tpu.memory_space<vmem>>, vector<64x128xf32>
    %cst_14 = arith.constant dense<0.000000e+00> : vector<16x128xf32>
    %25 = tpu.matmul %23, %24, %cst_14 {dimension_numbers = #tpu.dot_dimension_numbers<[1], [0], [0], [1], [0, 0, 1, 1], [], []>} : vector<16x64xf32>, vector<64x128xf32>, vector<16x128xf32> -> vector<16x128xf32>
    %c0_15 = arith.constant 0 : index
    %c0_16 = arith.constant 0 : index
    %26 = vector.load %arg7[%c0_15, %c0_16] : memref<1x128xf32, #tpu.memory_space<vmem>>, vector<1x128xf32>
    %27 = vector.broadcast %26 : vector<1x128xf32> to vector<16x128xf32>
    %28 = arith.addf %25, %27 : vector<16x128xf32>
    %c0_17 = arith.constant 0 : index
    %c0_18 = arith.constant 0 : index
    %29 = vector.load %arg8[%c0_17, %c0_18] : memref<16x128xf32, #tpu.memory_space<vmem>>, vector<16x128xf32>
    tpu.vector_store %arg8[%c0_17, %c0_18], %28 {strides = array<i32>} : memref<16x128xf32, #tpu.memory_space<vmem>>, vector<16x128xf32>,
    return
  }
  func.func @transform_0(%arg0: i32) -> (i32, i32) {
    %c0_i32 = arith.constant 0 : i32
    %c0_i32_0 = arith.constant 0 : i32
    return %arg0, %c0_i32 : i32, i32
  }
  func.func @transform_1(%arg0: i32) -> (i32, i32) {
    %c0_i32 = arith.constant 0 : i32
    %c0_i32_0 = arith.constant 0 : i32
    %c0_i32_1 = arith.constant 0 : i32
    return %c0_i32, %c0_i32_0 : i32, i32
  }
  func.func @transform_2(%arg0: i32) -> (i32, i32) {
    %c0_i32 = arith.constant 0 : i32
    %c0_i32_0 = arith.constant 0 : i32
    %c0_i32_1 = arith.constant 0 : i32
    return %c0_i32, %c0_i32_0 : i32, i32
  }
  func.func @transform_3(%arg0: i32) -> (i32, i32) {
    %c0_i32 = arith.constant 0 : i32
    %c0_i32_0 = arith.constant 0 : i32
    %c0_i32_1 = arith.constant 0 : i32
    return %c0_i32, %c0_i32_0 : i32, i32
  }
  func.func @transform_4(%arg0: i32) -> (i32, i32) {
    %c0_i32 = arith.constant 0 : i32
    %c0_i32_0 = arith.constant 0 : i32
    %c0_i32_1 = arith.constant 0 : i32
    return %c0_i32, %c0_i32_0 : i32, i32
  }
  func.func @transform_5(%arg0: i32) -> (i32, i32) {
    %c0_i32 = arith.constant 0 : i32
    %c0_i32_0 = arith.constant 0 : i32
    %c0_i32_1 = arith.constant 0 : i32
    return %c0_i32, %c0_i32_0 : i32, i32
  }
  func.func @transform_6(%arg0: i32) -> (i32, i32) {
    %c0_i32 = arith.constant 0 : i32
    %c0_i32_0 = arith.constant 0 : i32
    %c0_i32_1 = arith.constant 0 : i32
    return %c0_i32, %c0_i32_0 : i32, i32
  }
  func.func @transform_7(%arg0: i32) -> (i32, i32) {
    %c0_i32 = arith.constant 0 : i32
    %c0_i32_0 = arith.constant 0 : i32
    return %arg0, %c0_i32 : i32, i32
  }
}

</mosaic_0001>

<bundles_post_ra>
// kernel: simple_score_fn_forward.1
= control target key start
LH: loop header
LB: loop body
LE: loop exit
PB: predicated region body
PF: predicated region fallthrough
CT: control target
= control target key end

     0   :  { %v186_v0 = vmov 0   ;;  %v187_v8 = vmov 1   ;;  %vm121_vm0 = vcmask 523264   ;;  %s327_s0 = inlined_call_operand.vmem [shape: f32[16,2], index: 0, kind: input, shape index: {}]   ;;  %s328_s3 = inlined_call_operand.vmem [shape: f32[128,64], index: 3, kind: input, shape index: {}]   ;;  %s329_s1 = inlined_call_operand.vmem [shape: f32[2,128], index: 1, kind: input, shape index: {}]   ;;  %s330_s2 = inlined_call_operand.vmem [shape: f32[1,128], index: 2, kind: input, shape index: {}]   ;;  %s331_s4 = inlined_call_operand.vmem [shape: f32[1,64], index: 4, kind: input, shape index: {}]   ;;  %s332_s5 = inlined_call_operand.vmem [shape: f32[64,128], index: 5, kind: input, shape index: {}]   ;;  %s333_s6 = inlined_call_operand.vmem [shape: f32[1,128], index: 6, kind: input, shape index: {}]   ;;  %s334_s7 = inlined_call_operand.vmem [shape: f32[16,128], index: 7, kind: output, shape index: {}]  }
   0x1   :  { %179 = vset.pattern.permute.xlu1 %v186_v0  ;;  %177 = vset.pattern.permute.xlu0 %v186_v0  ;;  %v27_v1 = vld [vmem:[%s327_s0 + $0x8] sm:$0xff]  ;;  %v26_v2 = vld [vmem:[%s327_s0] sm:$0xff]  ;;  %v79_v3 = vld [vmem:[%s328_s3 + $0x78] sm:$0xff] }
   0x2   :  { %36 = vperm.xlu1 %179, %v27_v1   ;;  %31 = vperm.xlu0 %177, %v26_v2   ;;  %v78_v4 = vld [vmem:[%s328_s3 + $0x70] sm:$0xff]  ;;  %v77_v5 = vld [vmem:[%s328_s3 + $0x68] sm:$0xff]  ;;  %v76_v6 = vld [vmem:[%s328_s3 + $0x60] sm:$0xff] }
   0x3   :  { %84 = vmatpush.msra.mxu0 %v79_v3  ;;  %159 = vmatpush.msra.mxu2 %v79_v3  ;;  %v75_v7 = vld [vmem:[%s328_s3 + $0x58] sm:$0xff]  ;;  %v74_v9 = vld [vmem:[%s328_s3 + $0x50] sm:$0xff]  ;;  %v73_v10 = vld [vmem:[%s328_s3 + $0x48] sm:$0xff] }
   0x4   :  { %v72_v11 = vld [vmem:[%s328_s3 + $0x40] sm:$0xff]  ;;  %v71_v12 = vld [vmem:[%s328_s3 + $0x38] sm:$0xff]  ;;  %v70_v13 = vld [vmem:[%s328_s3 + $0x30] sm:$0xff] }
   0x5   :  { %85 = vmatpush.msra.mxu0 %v78_v4  ;;  %160 = vmatpush.msra.mxu2 %v78_v4  ;;  %v69_v14 = vld [vmem:[%s328_s3 + $0x28] sm:$0xff]  ;;  %v68_v15 = vld [vmem:[%s328_s3 + $0x20] sm:$0xff]  ;;  %v67_v16 = vld [vmem:[%s328_s3 + $0x18] sm:$0xff] }
   0x6   :  { %v66_v17 = vld [vmem:[%s328_s3 + $0x10] sm:$0xff]  ;;  %v65_v18 = vld [vmem:[%s328_s3 + $0x8] sm:$0xff]  ;;  %v64_v19 = vld [vmem:[%s328_s3] sm:$0xff] }
   0x7   :  { %86 = vmatpush.msra.mxu0 %v77_v5  ;;  %161 = vmatpush.msra.mxu2 %v77_v5  ;;  %v116_v20 = vld [vmem:[%s332_s5 + $0x38] sm:$0xff]  ;;  %v115_v21 = vld [vmem:[%s332_s5 + $0x30] sm:$0xff]  ;;  %v114_v22 = vld [vmem:[%s332_s5 + $0x28] sm:$0xff] }
   0x8   :  { %136 = vmatpush.msra.mxu1 %v116_v20  ;;  %v113_v23 = vld [vmem:[%s332_s5 + $0x20] sm:$0xff]  ;;  %v112_v24 = vld [vmem:[%s332_s5 + $0x18] sm:$0xff]  ;;  %v111_v42 = vld [vmem:[%s332_s5 + $0x10] sm:$0xff] }
   0x9   :  { %87 = vmatpush.msra.mxu0 %v76_v6  ;;  %162 = vmatpush.msra.mxu2 %v76_v6  ;;  %v181_v27 = vld [vmem:[%s329_s1] ss:$0 sm:$0xff]  ;;  %v182_v28 = vld [vmem:[%s329_s1 + $0x1] ss:$0 sm:$0xff]  ;;  %v110_v43 = vld [vmem:[%s332_s5 + $0x8] sm:$0xff] }
   0xa   :  { %180 = vset.pattern.permute.xlu1 %v187_v8  ;;  %178 = vset.pattern.permute.xlu0 %v187_v8  ;;  %v183_v35 = vld [vmem:[%s330_s2] ss:$0 sm:$0xff] }
   0xb   :  { %48 = vperm.xlu1 %180, %v27_v1   ;;  %44 = vperm.xlu0 %178, %v26_v2   ;;  %v109_v44 = vld [vmem:[%s332_s5] sm:$0xff] }
   0xc   :  { %88 = vmatpush.msra.mxu0 %v75_v7  ;;  %163 = vmatpush.msra.mxu2 %v75_v7  ;;  %v184_v45 = vld [vmem:[%s331_s4] ss:$0 sm:$0xff] }
   0xd   :  { %137 = vmatpush.msra.mxu1 %v115_v21  ;;  %v185_v52 = vld [vmem:[%s333_s6] ss:$0 sm:$0xff] }
   0xe   :  { %89 = vmatpush.msra.mxu0 %v74_v9  ;;  %164 = vmatpush.msra.mxu2 %v74_v9 }
   0xf   :  { %138 = vmatpush.msra.mxu1 %v114_v22 }
  0x10   :  { %90 = vmatpush.msra.mxu0 %v73_v10  ;;  %165 = vmatpush.msra.mxu2 %v73_v10 }
  0x11   :  { %139 = vmatpush.msra.mxu1 %v113_v23 }
  0x12   :  { %91 = vmatpush.msra.mxu0 %v72_v11  ;;  %166 = vmatpush.msra.mxu2 %v72_v11 }
  0x13   :  { %140 = vmatpush.msra.mxu1 %v112_v24 }
  0x14   :  { %92 = vmatpush.msra.mxu0 %v71_v12  ;;  %167 = vmatpush.msra.mxu2 %v71_v12 }
  0x15   :  { %141 = vmatpush.msra.mxu1 %v111_v42 }
  0x16   :  { %93 = vmatpush.msra.mxu0 %v70_v13  ;;  %168 = vmatpush.msra.mxu2 %v70_v13 }
  0x17   :  { %142 = vmatpush.msra.mxu1 %v110_v43 }
  0x18   :  { %94 = vmatpush.msra.mxu0 %v69_v14  ;;  %169 = vmatpush.msra.mxu2 %v69_v14 }
  0x19   :  { %143 = vmatpush.msra.mxu1 %v109_v44 }
  0x1a   :  { %95 = vmatpush.msra.mxu0 %v68_v15  ;;  %170 = vmatpush.msra.mxu2 %v68_v15 }
  0x1c   :  { %96 = vmatpush.msra.mxu0 %v67_v16  ;;  %171 = vmatpush.msra.mxu2 %v67_v16 }
  0x1e   :  { %97 = vmatpush.msra.mxu0 %v66_v17  ;;  %172 = vmatpush.msra.mxu2 %v66_v17 }
  0x20   :  { %98 = vmatpush.msra.mxu0 %v65_v18  ;;  %173 = vmatpush.msra.mxu2 %v65_v18 }
  0x22   :  { %99 = vmatpush.msra.mxu0 %v64_v19  ;;  %174 = vmatpush.msra.mxu2 %v64_v19 }
  0x74   :  { %v32_v25 = vpop.permute.xlu0 %31  ;;  %v37_v26 = vpop.permute.xlu1 %36 }
  0x75   :  { %v40_v31 = vmul.f32 %v181_v27, %v32_v25  ;;  %v41_v32 = vmul.f32 %v181_v27, %v37_v26 }
  0x7d   :  { %v49_v29 = vpop.permute.xlu1 %48  ;;  %v45_v30 = vpop.permute.xlu0 %44 }
  0x7e   :  { %v53_v33 = vmul.f32 %v182_v28, %v49_v29  ;;  %v52_v34 = vmul.f32 %v182_v28, %v45_v30 }
  0x80   :  { %v55_v36 = vadd.f32 %v53_v33, %v41_v32  ;;  %v54_v37 = vadd.f32 %v52_v34, %v40_v31 }
  0x82   :  { %v60_v38 = vadd.f32 %v183_v35, %v54_v37  ;;  %v61_v39 = vadd.f32 %v183_v35, %v55_v36 }
  0x84   :  { %v62_v40 = vmax.f32 %v60_v38, 0.0  ;;  %v63_v41 = vmax.f32 %v61_v39, 0.0 }
  0x86   :  { %100 = vmatmul.f32.vlgmr.msra.gmra.mxu0 %v62_v40  ;;  %103 = vmatmul.f32.vlgmr.msra.gmra.mxu2 %v63_v41 }
 0x103   :  { %v101_v46 = vpop.f32.mrf.mxu0 }
 0x104   :  { %v102_v47 = vadd.f32 %v184_v45, %v101_v46 }
 0x106   :  { %v107_v48 = vmax.f32 %v102_v47, 0.0 }
 0x108   :  { %157 = vmatmul.msk.f32.vlgmr.msra.gmra.mxu1 %vm121_vm0, %v107_v48 }
 0x109   :  { %v104_v49 = vpop.f32.mrf.mxu2 }
 0x10a   :  { %v105_v50 = vadd.f32 %v184_v45, %v104_v49 }
 0x10c   :  { %v108_v51 = vmax.f32 %v105_v50, 0.0 }
 0x110   :  { %158 = vmatmul.msk.f32.gmra.mxu1 %vm121_vm0, %v108_v51 }
 0x185   :  { %v145_v53 = vpop.f32.mrf.mxu1 }
 0x186   :  { %v146_v54 = vadd.f32 %v185_v52, %v145_v53 }
 0x188   :  { %151 = vst [vmem:[%s334_s7] sm:$0xff] %v146_v54 }
 0x18d   :  { %v148_v55 = vpop.f32.mrf.mxu1 }
 0x18e   :  { %v149_v56 = vadd.f32 %v185_v52, %v148_v55 }
 0x190   :  { %152 = vst [vmem:[%s334_s7 + $0x8] sm:$0xff] %v149_v56 }

</bundles_post_ra>
